<compile_context>
chip_gen: v6e
topology: v6e:2x2x1
jax: 0.10.0
libtpu: 0.0.40
codegen_flags: <defaults>
</compile_context>

<pallas_src>
import jax
import jax.numpy as jnp
from jax.experimental import pallas as pl
from jax.experimental.pallas import tpu as pltpu


# ----------------------------- kernel ---------------------------------------

def _leaky(h):
    return jnp.maximum(h, 0.01 * h)          # LeakyReLU(0.01)


def _small_k_mac(w, x):
    """(R, K) @ (K, TN) with tiny K as VPU broadcast multiply-adds (outer products).

    A K=2..4 contraction fills only 2-4/256 of the MXU and pays push/pop latency in
    an already serial chain of small matmuls, so it is cheaper on the VPU."""
    k = w.shape[1]
    acc = w[:, 0:1] * x[0:1, :]
    for j in range(1, k):
        acc = acc + w[:, j:j + 1] * x[j:j + 1, :]
    return acc


def _make_kernel(C, C1, C2, H, woff, boff):
    TWO_H = 2 * H

    def kernel(x_ref, w_ref, b_ref, z_ref, ld_ref, ld_acc):
        nj = pl.program_id(1)
        x = x_ref[0]                                            # (C, TN), TN on lanes

        # static slices of the packed parameter buffers (8-aligned row offsets)
        wc   = w_ref[woff["wc"]:woff["wc"] + C,        0:C]
        a1   = w_ref[woff["a1"]:woff["a1"] + H,        0:C1]
        a2   = w_ref[woff["a2"]:woff["a2"] + H,        0:H]
        a3   = w_ref[woff["a3"]:woff["a3"] + C2,       0:H]
        fg1  = w_ref[woff["fg1"]:woff["fg1"] + TWO_H,  0:C1]
        fg2  = w_ref[woff["fg2"]:woff["fg2"] + TWO_H,  0:TWO_H]
        fg3  = w_ref[woff["fg3"]:woff["fg3"] + 2 * C2, 0:TWO_H]

        bc   = b_ref[boff["bc"]:boff["bc"] + C,          :]
        ab2  = b_ref[boff["ab2"]:boff["ab2"] + H,        :]
        ab3  = b_ref[boff["ab3"]:boff["ab3"] + C2,       :]
        fgb2 = b_ref[boff["fgb2"]:boff["fgb2"] + TWO_H,  :]
        fgb3 = b_ref[boff["fgb3"]:boff["fgb3"] + 2 * C2, :]

        # --- ActNorm + inv1x1 + global channel reverse, all folded into wc/bc ---
        #   rows [0, C2)  = q0 = flip(y2_pre)    (conditioner half after 'reverse')
        #   rows [C2, C)  = p  = flip(y1)        (transformed half after 'reverse')
        y = _small_k_mac(wc, x) + bc
        q0 = y[:C2]
        p = y[C2:]

        # --- Coupling 1 (additive); channel flips folded into a1 / a3 ---
        h = _leaky(_small_k_mac(a1, p))
        h = _leaky(jnp.dot(a2, h, preferred_element_type=jnp.float32) + ab2)
        u = q0 + jnp.dot(a3, h, preferred_element_type=jnp.float32) + ab3

        # --- Coupling 2 (affine); F and G fused into one block-diagonal MLP ---
        h = _leaky(_small_k_mac(fg1, u))
        h = _leaky(jnp.dot(fg2, h, preferred_element_type=jnp.float32) + fgb2)
        st = jnp.dot(fg3, h, preferred_element_type=jnp.float32) + fgb3
        s = st[:C2]          # log-scale (unclamped: module uses clamp=None)
        t = st[C2:]          # shift
        v = p * jnp.exp(s) + t

        # direct sub-slice stores, already in final (reversed) channel order
        z_ref[0, :C2, :] = u.astype(z_ref.dtype)
        z_ref[0, C2:, :] = v.astype(z_ref.dtype)

        # --- per-batch affine-coupling log-det, accumulated across N tiles ---
        @pl.when(nj == 0)
        def _():
            ld_acc[...] = jnp.zeros_like(ld_acc)

        ld_acc[...] += jnp.sum(s)

        @pl.when(nj == pl.num_programs(1) - 1)
        def _():
            ld_ref[0] = ld_acc[...]

    return kernel


# ----------------------------- packing helpers --------------------------------

def _pack_rows(mats, width):
    """Pad each matrix to `width` cols and a multiple-of-8 row count, stack rows.

    Returns (packed_array, row_offsets)."""
    blocks, offs, r = [], [], 0
    for m in mats:
        rows, cols = m.shape
        rpad = (-rows) % 8
        blocks.append(jnp.pad(m.astype(jnp.float32),
                              ((0, rpad), (0, width - cols))))
        offs.append(r)
        r += rows + rpad
    return jnp.concatenate(blocks, axis=0), offs


def _blockdiag(a, b):
    za = jnp.zeros((a.shape[0], b.shape[1]), jnp.float32)
    zb = jnp.zeros((b.shape[0], a.shape[1]), jnp.float32)
    return jnp.concatenate(
        [jnp.concatenate([a, za], axis=1),
         jnp.concatenate([zb, b], axis=1)], axis=0)


def _pick_tile_n(n, cap=2048):
    """Largest multiple of 128 that divides n and is <= cap (VMEM-friendly on v7x)."""
    best, t = 128, 128
    while t <= min(n, cap):
        if n % t == 0:
            best = t
        t += 128
    return best


# ----------------------------- wrapper ---------------------------------------

def multi_scale_flow_block(x, params, tile_n=None):
    """x: (B, N, C) float32.  Returns (z, logdet) matching the PyTorch module."""
    B, N, C = x.shape
    assert C % 2 == 0, "kernel path assumes even idim (idim=4 config)"
    assert N % 128 == 0, "point axis must be a multiple of 128 (lane axis)"
    C1 = C // 2
    C2 = C - C1

    logs, bias, wperm = params["logs"], params["bias"], params["wperm"]
    aw1, aw2, ab2, aw3, ab3 = params["A"]
    fw1, fw2, fb2, fw3, fb3 = params["F"]
    gw1, gw2, gb2, gw3, gb3 = params["G"]
    H = aw1.shape[1]

    if tile_n is None:
        tile_n = _pick_tile_n(N)
    assert N % tile_n == 0 and tile_n % 128 == 0
    nt = N // tile_n

    # ---- parameter folding (plain-JAX glue, column-vector/transposed form) ----
    # ActNorm + inv1x1 + the module's trailing 'reverse' permutation fused into one
    # matrix (all output rows flipped), so the kernel's first matmul already yields
    # [flip(y2_pre); flip(y1)] — i.e. channels in the final output order.
    wc_t = (wperm.T * jnp.exp(logs))[::-1, :]                         # (C, C)
    bc_t = (wperm.T @ bias.T)[::-1, :]                                # (C, 1)

    # additive net (transposed), with its input flip (it sees flip(y1)) folded into
    # the first layer and its output flip (added into flip(y2)) into the last layer
    a1_t = aw1[::-1, :].T                                             # (H, C1)
    a2_t, ab2_t = aw2.T, ab2.T
    a3_t = aw3[:, ::-1].T                                             # (C2, H)
    ab3_t = ab3[:, ::-1].T                                            # (C2, 1)

    # fused F/G net for the affine coupling: the conditioner is already the flipped
    # second half (u), so no additional flips are needed here.
    fg1_t = jnp.concatenate([fw1.T, gw1.T], axis=0)                   # (2H, C1)
    fg2_t = _blockdiag(fw2.T, gw2.T)                                  # (2H, 2H)
    fgb2_t = jnp.concatenate([fb2.T, gb2.T], axis=0)                  # (2H, 1)
    fg3_t = _blockdiag(fw3.T, gw3.T)                                  # (2C2, 2H)
    fgb3_t = jnp.concatenate([fb3.T, gb3.T], axis=0)                  # (2C2, 1)

    wmat, woffs = _pack_rows([wc_t, a1_t, a2_t, a3_t, fg1_t, fg2_t, fg3_t],
                             max(128, 2 * H))
    bvec, boffs = _pack_rows([bc_t, ab2_t, ab3_t, fgb2_t, fgb3_t], 1)
    woff = dict(zip(["wc", "a1", "a2", "a3", "fg1", "fg2", "fg3"], woffs))
    boff = dict(zip(["bc", "ab2", "ab3", "fgb2", "fgb3"], boffs))

    # lane-dense layout: point axis N on lanes, channels on sublanes
    xt = jnp.transpose(x, (0, 2, 1))                                  # (B, C, N)

    kernel = _make_kernel(C, C1, C2, H, woff, boff)

    zk, ld = pl.pallas_call(
        kernel,
        grid=(B, nt),
        in_specs=[
            pl.BlockSpec((1, C, tile_n), lambda b, j: (b, 0, j)),
            pl.BlockSpec(wmat.shape, lambda b, j: (0, 0)),   # grid-invariant
            pl.BlockSpec(bvec.shape, lambda b, j: (0, 0)),   # grid-invariant
        ],
        out_specs=[
            pl.BlockSpec((1, C, tile_n), lambda b, j: (b, 0, j)),
            pl.BlockSpec((1, 1, 1), lambda b, j: (b, 0, 0)),
        ],
        out_shape=(
            jax.ShapeDtypeStruct((B, C, N), x.dtype),
            jax.ShapeDtypeStruct((B, 1, 1), jnp.float32),
        ),
        scratch_shapes=[pltpu.VMEM((1, 1), jnp.float32)],
        compiler_params=pltpu.CompilerParams(
            dimension_semantics=("parallel", "arbitrary")),
    )(xt, wmat, bvec)

    # kernel already emits the final channel order; only transpose back to (B, N, C)
    z = jnp.transpose(zk, (0, 2, 1))

    # parameter-only log-dets (scalars) computed in plain JAX (glue)
    logdet0 = N * jnp.sum(logs)                       # ActNorm
    logdet1 = N * jnp.linalg.slogdet(wperm)[1]        # inv1x1 permutation
    logdet = logdet0 + logdet1 + ld[:, 0, 0]          # + per-batch affine coupling
    return z, logdet


# ----------------------------- reference (pure JAX) ---------------------------

def _mlp_ref(v, w1, w2, b2, w3, b3):
    h = v @ w1
    h = jnp.where(h > 0, h, 0.01 * h)
    h = h @ w2 + b2
    h = jnp.where(h > 0, h, 0.01 * h)
    return h @ w3 + b3


def reference_forward(x, params):
    B, N, C = x.shape
    C1 = C // 2
    logs, bias, wperm = params["logs"], params["bias"], params["wperm"]

    y = x * jnp.exp(logs) + bias
    ld0 = N * jnp.sum(logs)
    y = y @ wperm
    ld1 = N * jnp.linalg.slogdet(wperm)[1]

    h1, h2 = y[..., :C1], y[..., C1:]
    h2 = h2 + _mlp_ref(h1, *params["A"])
    y = jnp.concatenate([h1, h2], axis=-1)

    y = y[..., ::-1]

    h1, h2 = y[..., :C1], y[..., C1:]
    s = _mlp_ref(h1, *params["F"])
    sh = _mlp_ref(h1, *params["G"])
    h2 = h2 * jnp.exp(s) + sh
    y = jnp.concatenate([h1, h2], axis=-1)
    ld4 = jnp.sum(s.reshape(B, -1), axis=1)

    return y, ld0 + ld1 + ld4


# ----------------------------- main -------------------------------------------

if __name__ == "__main__":
    B, N, C, H = 2, 1024, 4, 32       # batch, points, idim, hdim; cdim=None
    TILE_N = 256                      # several tiles -> exercises log-det accumulation
    C1, C2 = C // 2, C - C // 2

    key = jax.random.PRNGKey(0)
    keys = jax.random.split(key, 24)
    ki = iter(keys)

    def lin(din, dout, scale):
        return scale * jax.random.normal(next(ki), (din, dout), jnp.float32)

    def make_net(din, dh, dout):
        return (
            lin(din, dh, 0.2),                                   # Linear(no bias)
            lin(dh, dh, 0.2), 0.05 * jax.random.normal(next(ki), (1, dh), jnp.float32),
            lin(dh, dout, 0.1), 0.05 * jax.random.normal(next(ki), (1, dout), jnp.float32),
        )

    logs = 0.1 * jax.random.normal(next(ki), (1, C), jnp.float32)
    bias = 0.1 * jax.random.normal(next(ki), (1, C), jnp.float32)
    q, _ = jnp.linalg.qr(jax.random.normal(next(ki), (C, C), jnp.float32))
    d = 0.2 * jax.random.normal(next(ki), (C,), jnp.float32)
    wperm = q * jnp.exp(d)[None, :]                               # invertible 1x1

    params = {
        "logs": logs,
        "bias": bias,
        "wperm": wperm,
        "A": make_net(C1, H, C2),   # coupling1 additive net
        "F": make_net(C1, H, C2),   # coupling2 log-scale net
        "G": make_net(C1, H, C2),   # coupling2 shift net
    }

    x = jax.random.normal(next(ki), (B, N, C), jnp.float32)

    z, logdet = multi_scale_flow_block(x, params, tile_n=TILE_N)
    jax.block_until_ready((z, logdet))

    z_ref, logdet_ref = reference_forward(x, params)
    assert jnp.allclose(z, z_ref, atol=1e-3, rtol=1e-3), "output mismatch"
    assert jnp.allclose(logdet, logdet_ref, atol=5e-3, rtol=1e-3), "logdet mismatch"

    print("KERNEL_OK")
</pallas_src>

<mosaic_0001>
module attributes {stable_mosaic.version = 11 : i64} {
  func.func @kernel(%arg0: i32, %arg1: i32, %arg2: memref<1x4x256xf32, #tpu.memory_space<vmem>>, %arg3: memref<216x128xf32, #tpu.memory_space<vmem>>, %arg4: memref<120x1xf32, #tpu.memory_space<vmem>>, %arg5: memref<1x4x256xf32, #tpu.memory_space<vmem>>, %arg6: memref<1x1x1xf32, #tpu.memory_space<vmem>>, %arg7: memref<1x1xf32, #tpu.memory_space<vmem>>) attributes {dimension_semantics = [#tpu.dimension_semantics<parallel>, #tpu.dimension_semantics<arbitrary>], iteration_bounds = array<i64: 2, 4>, scalar_prefetch = 0 : i64, scratch_operands = 1 : i64, tpu.core_type = #tpu.core_type<tc>, window_params = [{transform_indices = @transform_0, window_bounds = array<i64: 1, 4, 256>}, {pipeline_mode = #tpu.pipeline_mode<synchronous>, transform_indices = @transform_1, window_bounds = array<i64: 216, 128>}, {pipeline_mode = #tpu.pipeline_mode<synchronous>, transform_indices = @transform_2, window_bounds = array<i64: 120, 1>}, {transform_indices = @transform_3, window_bounds = array<i64: 1, 4, 256>}, {transform_indices = @transform_4, window_bounds = array<i64: 1, 1, 1>}]} {
    %c0 = arith.constant 0 : index
    %c0_0 = arith.constant 0 : index
    %c0_1 = arith.constant 0 : index
    %0 = vector.load %arg2[%c0, %c0_0, %c0_1] : memref<1x4x256xf32, #tpu.memory_space<vmem>>, vector<1x4x256xf32>
    %1 = vector.shape_cast %0 : vector<1x4x256xf32> to vector<4x256xf32>
    %c0_2 = arith.constant 0 : index
    %c0_3 = arith.constant 0 : index
    %2 = vector.load %arg3[%c0_2, %c0_3] : memref<216x128xf32, #tpu.memory_space<vmem>>, vector<4x4xf32>
    %c8 = arith.constant 8 : index
    %c0_4 = arith.constant 0 : index
    %3 = vector.load %arg3[%c8, %c0_4] : memref<216x128xf32, #tpu.memory_space<vmem>>, vector<32x2xf32>
    %c40 = arith.constant 40 : index
    %c0_5 = arith.constant 0 : index
    %4 = vector.load %arg3[%c40, %c0_5] : memref<216x128xf32, #tpu.memory_space<vmem>>, vector<32x32xf32>
    %c72 = arith.constant 72 : index
    %c0_6 = arith.constant 0 : index
    %5 = vector.load %arg3[%c72, %c0_6] : memref<216x128xf32, #tpu.memory_space<vmem>>, vector<2x32xf32>
    %c80 = arith.constant 80 : index
    %c0_7 = arith.constant 0 : index
    %6 = vector.load %arg3[%c80, %c0_7] : memref<216x128xf32, #tpu.memory_space<vmem>>, vector<64x2xf32>
    %c144 = arith.constant 144 : index
    %c0_8 = arith.constant 0 : index
    %7 = vector.load %arg3[%c144, %c0_8] : memref<216x128xf32, #tpu.memory_space<vmem>>, vector<64x64xf32>
    %c208 = arith.constant 208 : index
    %c0_9 = arith.constant 0 : index
    %8 = vector.load %arg3[%c208, %c0_9] : memref<216x128xf32, #tpu.memory_space<vmem>>, vector<4x64xf32>
    %c0_10 = arith.constant 0 : index
    %c0_11 = arith.constant 0 : index
    %9 = vector.load %arg4[%c0_10, %c0_11] : memref<120x1xf32, #tpu.memory_space<vmem>>, vector<4x1xf32>
    %c8_12 = arith.constant 8 : index
    %c0_13 = arith.constant 0 : index
    %10 = vector.load %arg4[%c8_12, %c0_13] : memref<120x1xf32, #tpu.memory_space<vmem>>, vector<32x1xf32>
    %c40_14 = arith.constant 40 : index
    %c0_15 = arith.constant 0 : index
    %11 = vector.load %arg4[%c40_14, %c0_15] : memref<120x1xf32, #tpu.memory_space<vmem>>, vector<2x1xf32>
    %c48 = arith.constant 48 : index
    %c0_16 = arith.constant 0 : index
    %12 = vector.load %arg4[%c48, %c0_16] : memref<120x1xf32, #tpu.memory_space<vmem>>, vector<64x1xf32>
    %c112 = arith.constant 112 : index
    %c0_17 = arith.constant 0 : index
    %13 = vector.load %arg4[%c112, %c0_17] : memref<120x1xf32, #tpu.memory_space<vmem>>, vector<4x1xf32>
    %14 = vector.extract_strided_slice %2 {offsets = [0, 0], sizes = [4, 1], strides = [1, 1]} : vector<4x4xf32> to vector<4x1xf32>
    %15 = vector.extract_strided_slice %1 {offsets = [0, 0], sizes = [1, 256], strides = [1, 1]} : vector<4x256xf32> to vector<1x256xf32>
    %16 = vector.broadcast %14 : vector<4x1xf32> to vector<4x256xf32>
    %17 = vector.broadcast %15 : vector<1x256xf32> to vector<4x256xf32>
    %18 = arith.mulf %16, %17 : vector<4x256xf32>
    %19 = vector.extract_strided_slice %2 {offsets = [0, 1], sizes = [4, 1], strides = [1, 1]} : vector<4x4xf32> to vector<4x1xf32>
    %20 = vector.extract_strided_slice %1 {offsets = [1, 0], sizes = [1, 256], strides = [1, 1]} : vector<4x256xf32> to vector<1x256xf32>
    %21 = vector.broadcast %19 : vector<4x1xf32> to vector<4x256xf32>
    %22 = vector.broadcast %20 : vector<1x256xf32> to vector<4x256xf32>
    %23 = arith.mulf %21, %22 : vector<4x256xf32>
    %24 = arith.addf %18, %23 : vector<4x256xf32>
    %25 = vector.extract_strided_slice %2 {offsets = [0, 2], sizes = [4, 1], strides = [1, 1]} : vector<4x4xf32> to vector<4x1xf32>
    %26 = vector.extract_strided_slice %1 {offsets = [2, 0], sizes = [1, 256], strides = [1, 1]} : vector<4x256xf32> to vector<1x256xf32>
    %27 = vector.broadcast %25 : vector<4x1xf32> to vector<4x256xf32>
    %28 = vector.broadcast %26 : vector<1x256xf32> to vector<4x256xf32>
    %29 = arith.mulf %27, %28 : vector<4x256xf32>
    %30 = arith.addf %24, %29 : vector<4x256xf32>
    %31 = vector.extract_strided_slice %2 {offsets = [0, 3], sizes = [4, 1], strides = [1, 1]} : vector<4x4xf32> to vector<4x1xf32>
    %32 = vector.extract_strided_slice %1 {offsets = [3, 0], sizes = [1, 256], strides = [1, 1]} : vector<4x256xf32> to vector<1x256xf32>
    %33 = vector.broadcast %31 : vector<4x1xf32> to vector<4x256xf32>
    %34 = vector.broadcast %32 : vector<1x256xf32> to vector<4x256xf32>
    %35 = arith.mulf %33, %34 : vector<4x256xf32>
    %36 = arith.addf %30, %35 : vector<4x256xf32>
    %37 = vector.broadcast %9 : vector<4x1xf32> to vector<4x256xf32>
    %38 = arith.addf %36, %37 : vector<4x256xf32>
    %39 = vector.extract_strided_slice %38 {offsets = [0, 0], sizes = [2, 256], strides = [1, 1]} : vector<4x256xf32> to vector<2x256xf32>
    %40 = vector.extract_strided_slice %38 {offsets = [2, 0], sizes = [2, 256], strides = [1, 1]} : vector<4x256xf32> to vector<2x256xf32>
    %41 = vector.extract_strided_slice %3 {offsets = [0, 0], sizes = [32, 1], strides = [1, 1]} : vector<32x2xf32> to vector<32x1xf32>
    %42 = vector.extract_strided_slice %40 {offsets = [0, 0], sizes = [1, 256], strides = [1, 1]} : vector<2x256xf32> to vector<1x256xf32>
    %43 = vector.broadcast %41 : vector<32x1xf32> to vector<32x256xf32>
    %44 = vector.broadcast %42 : vector<1x256xf32> to vector<32x256xf32>
    %45 = arith.mulf %43, %44 : vector<32x256xf32>
    %46 = vector.extract_strided_slice %3 {offsets = [0, 1], sizes = [32, 1], strides = [1, 1]} : vector<32x2xf32> to vector<32x1xf32>
    %47 = vector.extract_strided_slice %40 {offsets = [1, 0], sizes = [1, 256], strides = [1, 1]} : vector<2x256xf32> to vector<1x256xf32>
    %48 = vector.broadcast %46 : vector<32x1xf32> to vector<32x256xf32>
    %49 = vector.broadcast %47 : vector<1x256xf32> to vector<32x256xf32>
    %50 = arith.mulf %48, %49 : vector<32x256xf32>
    %51 = arith.addf %45, %50 : vector<32x256xf32>
    %cst = arith.constant 0.00999999977 : f32
    %52 = vector.broadcast %cst : f32 to vector<32x256xf32>
    %53 = arith.mulf %52, %51 : vector<32x256xf32>
    %54 = arith.maximumf %51, %53 : vector<32x256xf32>
    %cst_18 = arith.constant dense<0.000000e+00> : vector<32x256xf32>
    %55 = tpu.matmul %4, %54, %cst_18 {dimension_numbers = #tpu.dot_dimension_numbers<[1], [0], [0], [1], [0, 0, 1, 1], [], []>} : vector<32x32xf32>, vector<32x256xf32>, vector<32x256xf32> -> vector<32x256xf32>
    %56 = vector.broadcast %10 : vector<32x1xf32> to vector<32x256xf32>
    %57 = arith.addf %55, %56 : vector<32x256xf32>
    %cst_19 = arith.constant 0.00999999977 : f32
    %58 = vector.broadcast %cst_19 : f32 to vector<32x256xf32>
    %59 = arith.mulf %58, %57 : vector<32x256xf32>
    %60 = arith.maximumf %57, %59 : vector<32x256xf32>
    %cst_20 = arith.constant dense<0.000000e+00> : vector<2x256xf32>
    %61 = tpu.matmul %5, %60, %cst_20 {dimension_numbers = #tpu.dot_dimension_numbers<[1], [0], [0], [1], [0, 0, 1, 1], [], []>} : vector<2x32xf32>, vector<32x256xf32>, vector<2x256xf32> -> vector<2x256xf32>
    %62 = arith.addf %39, %61 : vector<2x256xf32>
    %63 = vector.broadcast %11 : vector<2x1xf32> to vector<2x256xf32>
    %64 = arith.addf %62, %63 : vector<2x256xf32>
    %65 = vector.extract_strided_slice %6 {offsets = [0, 0], sizes = [64, 1], strides = [1, 1]} : vector<64x2xf32> to vector<64x1xf32>
    %66 = vector.extract_strided_slice %64 {offsets = [0, 0], sizes = [1, 256], strides = [1, 1]} : vector<2x256xf32> to vector<1x256xf32>
    %67 = vector.broadcast %65 : vector<64x1xf32> to vector<64x256xf32>
    %68 = vector.broadcast %66 : vector<1x256xf32> to vector<64x256xf32>
    %69 = arith.mulf %67, %68 : vector<64x256xf32>
    %70 = vector.extract_strided_slice %6 {offsets = [0, 1], sizes = [64, 1], strides = [1, 1]} : vector<64x2xf32> to vector<64x1xf32>
    %71 = vector.extract_strided_slice %64 {offsets = [1, 0], sizes = [1, 256], strides = [1, 1]} : vector<2x256xf32> to vector<1x256xf32>
    %72 = vector.broadcast %70 : vector<64x1xf32> to vector<64x256xf32>
    %73 = vector.broadcast %71 : vector<1x256xf32> to vector<64x256xf32>
    %74 = arith.mulf %72, %73 : vector<64x256xf32>
    %75 = arith.addf %69, %74 : vector<64x256xf32>
    %cst_21 = arith.constant 0.00999999977 : f32
    %76 = vector.broadcast %cst_21 : f32 to vector<64x256xf32>
    %77 = arith.mulf %76, %75 : vector<64x256xf32>
    %78 = arith.maximumf %75, %77 : vector<64x256xf32>
    %cst_22 = arith.constant dense<0.000000e+00> : vector<64x256xf32>
    %79 = tpu.matmul %7, %78, %cst_22 {dimension_numbers = #tpu.dot_dimension_numbers<[1], [0], [0], [1], [0, 0, 1, 1], [], []>} : vector<64x64xf32>, vector<64x256xf32>, vector<64x256xf32> -> vector<64x256xf32>
    %80 = vector.broadcast %12 : vector<64x1xf32> to vector<64x256xf32>
    %81 = arith.addf %79, %80 : vector<64x256xf32>
    %cst_23 = arith.constant 0.00999999977 : f32
    %82 = vector.broadcast %cst_23 : f32 to vector<64x256xf32>
    %83 = arith.mulf %82, %81 : vector<64x256xf32>
    %84 = arith.maximumf %81, %83 : vector<64x256xf32>
    %cst_24 = arith.constant dense<0.000000e+00> : vector<4x256xf32>
    %85 = tpu.matmul %8, %84, %cst_24 {dimension_numbers = #tpu.dot_dimension_numbers<[1], [0], [0], [1], [0, 0, 1, 1], [], []>} : vector<4x64xf32>, vector<64x256xf32>, vector<4x256xf32> -> vector<4x256xf32>
    %86 = vector.broadcast %13 : vector<4x1xf32> to vector<4x256xf32>
    %87 = arith.addf %85, %86 : vector<4x256xf32>
    %88 = vector.extract_strided_slice %87 {offsets = [0, 0], sizes = [2, 256], strides = [1, 1]} : vector<4x256xf32> to vector<2x256xf32>
    %89 = vector.extract_strided_slice %87 {offsets = [2, 0], sizes = [2, 256], strides = [1, 1]} : vector<4x256xf32> to vector<2x256xf32>
    %90 = math.exp %88 : vector<2x256xf32>
    %91 = arith.mulf %40, %90 : vector<2x256xf32>
    %92 = arith.addf %91, %89 : vector<2x256xf32>
    %c0_25 = arith.constant 0 : index
    %c0_26 = arith.constant 0 : index
    %c0_27 = arith.constant 0 : index
    %93 = vector.load %arg5[%c0_25, %c0_26, %c0_27] : memref<1x4x256xf32, #tpu.memory_space<vmem>>, vector<1x2x256xf32>
    %94 = vector.shape_cast %93 : vector<1x2x256xf32> to vector<2x256xf32>
    %95 = vector.shape_cast %64 : vector<2x256xf32> to vector<1x2x256xf32>
    tpu.vector_store %arg5[%c0_25, %c0_26, %c0_27], %95 {strides = array<i32>} : memref<1x4x256xf32, #tpu.memory_space<vmem>>, vector<1x2x256xf32>,
    %c0_28 = arith.constant 0 : index
    %c2 = arith.constant 2 : index
    %c0_29 = arith.constant 0 : index
    %96 = vector.load %arg5[%c0_28, %c2, %c0_29] : memref<1x4x256xf32, #tpu.memory_space<vmem>>, vector<1x2x256xf32>
    %97 = vector.shape_cast %96 : vector<1x2x256xf32> to vector<2x256xf32>
    %98 = vector.shape_cast %92 : vector<2x256xf32> to vector<1x2x256xf32>
    tpu.vector_store %arg5[%c0_28, %c2, %c0_29], %98 {strides = array<i32>} : memref<1x4x256xf32, #tpu.memory_space<vmem>>, vector<1x2x256xf32>,
    %c0_i32 = arith.constant 0 : i32
    %99 = arith.cmpi eq, %arg1, %c0_i32 : i32
    %100 = arith.extui %99 : i1 to i32
    %c0_i32_30 = arith.constant 0 : i32
    %101 = arith.cmpi ne, %100, %c0_i32_30 : i32
    scf.if %101 {
      %cst_37 = arith.constant 0.000000e+00 : f32
      %113 = vector.broadcast %cst_37 : f32 to vector<1x1xf32>
      %c0_38 = arith.constant 0 : index
      %c0_39 = arith.constant 0 : index
      %114 = vector.load %arg7[%c0_38, %c0_39] : memref<1x1xf32, #tpu.memory_space<vmem>>, vector<1x1xf32>
      tpu.vector_store %arg7[%c0_38, %c0_39], %113 {strides = array<i32>} : memref<1x1xf32, #tpu.memory_space<vmem>>, vector<1x1xf32>,
    } else {
    }
    %c0_31 = arith.constant 0 : index
    %c0_32 = arith.constant 0 : index
    %102 = vector.load %arg7[%c0_31, %c0_32] : memref<1x1xf32, #tpu.memory_space<vmem>>, vector<1x1xf32>
    %103 = vector.shape_cast %88 : vector<2x256xf32> to vector<1x2x256xf32>
    %cst_33 = arith.constant dense<0.000000e+00> : vector<1xf32>
    %104 = vector.multi_reduction <add>, %103, %cst_33 [1, 2] : vector<1x2x256xf32> to vector<1xf32>
    %105 = vector.shape_cast %104 : vector<1xf32> to vector<1x1x1xf32>
    %106 = vector.extract %105[0, 0, 0] : f32 from vector<1x1x1xf32>
    %107 = vector.broadcast %106 : f32 to vector<1x1xf32>
    %108 = arith.addf %102, %107 : vector<1x1xf32>
    %c0_34 = arith.constant 0 : index
    %c0_35 = arith.constant 0 : index
    %109 = vector.load %arg7[%c0_34, %c0_35] : memref<1x1xf32, #tpu.memory_space<vmem>>, vector<1x1xf32>
    tpu.vector_store %arg7[%c0_34, %c0_35], %108 {strides = array<i32>} : memref<1x1xf32, #tpu.memory_space<vmem>>, vector<1x1xf32>,
    %c3_i32 = arith.constant 3 : i32
    %110 = arith.cmpi eq, %arg1, %c3_i32 : i32
    %111 = arith.extui %110 : i1 to i32
    %c0_i32_36 = arith.constant 0 : i32
    %112 = arith.cmpi ne, %111, %c0_i32_36 : i32
    scf.if %112 {
      %c0_37 = arith.constant 0 : index
      %c0_38 = arith.constant 0 : index
      %113 = vector.load %arg7[%c0_37, %c0_38] : memref<1x1xf32, #tpu.memory_space<vmem>>, vector<1x1xf32>
      %c0_39 = arith.constant 0 : index
      %c0_40 = arith.constant 0 : index
      %c0_41 = arith.constant 0 : index
      %114 = vector.load %arg6[%c0_39, %c0_40, %c0_41] : memref<1x1x1xf32, #tpu.memory_space<vmem>>, vector<1x1x1xf32>
      %115 = vector.shape_cast %114 : vector<1x1x1xf32> to vector<1x1xf32>
      %116 = vector.shape_cast %113 : vector<1x1xf32> to vector<1x1x1xf32>
      tpu.vector_store %arg6[%c0_39, %c0_40, %c0_41], %116 {strides = array<i32>} : memref<1x1x1xf32, #tpu.memory_space<vmem>>, vector<1x1x1xf32>,
    } else {
    }
    return
  }
  func.func @transform_0(%arg0: i32, %arg1: i32) -> (i32, i32, i32) {
    %c0_i32 = arith.constant 0 : i32
    %c0_i32_0 = arith.constant 0 : i32
    return %arg0, %c0_i32, %arg1 : i32, i32, i32
  }
  func.func @transform_1(%arg0: i32, %arg1: i32) -> (i32, i32) {
    %c0_i32 = arith.constant 0 : i32
    %c0_i32_0 = arith.constant 0 : i32
    %c0_i32_1 = arith.constant 0 : i32
    return %c0_i32, %c0_i32_0 : i32, i32
  }
  func.func @transform_2(%arg0: i32, %arg1: i32) -> (i32, i32) {
    %c0_i32 = arith.constant 0 : i32
    %c0_i32_0 = arith.constant 0 : i32
    %c0_i32_1 = arith.constant 0 : i32
    return %c0_i32, %c0_i32_0 : i32, i32
  }
  func.func @transform_3(%arg0: i32, %arg1: i32) -> (i32, i32, i32) {
    %c0_i32 = arith.constant 0 : i32
    %c0_i32_0 = arith.constant 0 : i32
    return %arg0, %c0_i32, %arg1 : i32, i32, i32
  }
  func.func @transform_4(%arg0: i32, %arg1: i32) -> (i32, i32, i32) {
    %c0_i32 = arith.constant 0 : i32
    %c0_i32_0 = arith.constant 0 : i32
    %c0_i32_1 = arith.constant 0 : i32
    return %arg0, %c0_i32, %c0_i32_0 : i32, i32, i32
  }
}

</mosaic_0001>

<bundles_post_ra>
// kernel: tpu_custom_call.1
= control target key start
LH: loop header
LB: loop body
LE: loop exit
PB: predicated region body
PF: predicated region fallthrough
CT: control target
= control target key end

     0   :  { %s2026_s0 = inlined_call_operand.vmem [shape: f32[2,4,1024], index: 0, kind: input, shape index: {}]   ;;  %s2027_s1 = inlined_call_operand.hbm [shape: f32[216,128], index: 1, kind: input, shape index: {}]   ;;  %s2028_s2 = inlined_call_operand.vmem [shape: f32[120,1], index: 2, kind: input, shape index: {}]   ;;  %s2029_s3 = inlined_call_operand.hbm [shape: f32[2,4,1024], index: 3, kind: output, shape index: {0}]   ;;  %s2030_s4 = inlined_call_operand.vmem [shape: f32[2,1,1], index: 4, kind: output, shape index: {1}]  }
   0x1   :  { %2031 = sst [smem:[#allocation9_spill]] %s2026_s0 }
   0x2   :  { %10 = vsyncpa [#allocation4], 0 }
   0x3   :  { %11 = vsyncpa [#allocation5], 0 }
   0x4   :  { %13 = vsyncpa [#allocation5 + $0x1], 0  ;;  %s1664_s15 = smov 0   ;;  %s1666_s16 = smov 0  }
   0x5   :  { %s1668_s17 = smov 0   ;;  %s1670_s18 = smov 0  }
   0x6   :  { %s1672_s19 = smov 0   ;;  %s1674_s20 = smov 0  }
   0x7   :  { %s1676_s21 = smov 0   ;;  %s1678_s22 = smov 0  }
   0x8 LB: > { %s1362_s23 = sadd.s32 4294967295, %s1627_s22   ;;  %s1363_s24 = sadd.s32 4294967294, %s1627_s22   ;;  %s1627_s22 = sphi %s1678_s22, %s19_s22   ;;  %s1623_s21 = sphi %s1676_s21, %s2044_s21   ;;  %s1619_s20 = sphi %s1674_s20, %s2043_s20   ;;  %s1615_s19 = sphi %s1672_s19, %s2042_s19   ;;  %s1611_s18 = sphi %s1670_s18, %s2041_s18   ;;  %s1607_s17 = sphi %s1668_s17, %s2040_s17   ;;  %s1603_s16 = sphi %s1666_s16, %s2039_s16   ;;  %s1599_s15 = sphi %s1664_s15, %s2038_s15  }
   0x9   : > { %s28_s25 = sadd.s32 1, %s1619_s20  ;;  %s31_s26 = sadd.s32 1, %s1623_s21 }
   0xa   : > { %p29_p0 = scmp.ge.s32.totalorder %s28_s25, 4  ;;  %s110_s27 = sadd.s32 1, %s1607_s17 }
   0xb   : > { %p120_p1 = scmp.ne.s32.totalorder %s1607_s17, %s1603_s16  ;;  %p121_p2 = scmp.eq.s32.totalorder %s1362_s23, 7 }
   0xc   : > { %s2046_s25 = smov (%p29_p0, %s28_s25), 0  ;;  %s2048_s26 = smov (!%p29_p0, %s31_s26), %s1623_s21 }
   0xd   : > { %s106_s28 = ssub.s32 %s1619_s20, %s2046_s25  ;;  %p1716_p3 = por %p121_p2, %p120_p1 }
   0xe   : > { %p33_p4 = scmp.ge.s32.totalorder %s2048_s26, 2  ;;  %p126_p5 = scmp.ne.s32.totalorder %s1603_s16, %s1599_s15 }
   0xf   : > { %p127_p6 = scmp.eq.s32.totalorder %s1363_s24, 7  ;;  %p1364_p7 = scmp.ge.s32.totalorder %s1627_s22, 1 }
  0x10   : > { %s2050_s26 = smov (%p33_p4, %s2048_s26), 0  ;;  %p160_p9 = scmp.lt.s32.totalorder %s1627_s22, 9 }
  0x11   : > { %p1725_p8 = por %p127_p6, %p126_p5  ;;  %s105_s5 = ssub.s32 %s1623_s21, %s2050_s26 }
  0x12   : > { %s107_s6 = sor.u32 %s106_s28, %s105_s5  ;;  %p1732_p10 = pnand %p1364_p7, %p160_p9 }
  0x13   : > { %p108_p11 = scmp.eq.s32.totalorder %s107_s6, 0  ;;  %p1736_p12 = scmp.eq.s32.totalorder %s1362_s23, 0 }
  0x14   : > { %p1403_p13 = pneg %p1732_p10  ;;  %s1629_s10 = smov [#allocation3]  }
  0x15   : > { %s1743_s9 = scalar_select %p108_p11, %s1607_s17, %s110_s27  }
  0x16   : > { %s172_s11 = sshll.u32 %s1629_s10, 4  ;;  %p1747_p0 = pnand %p1736_p12, %p1403_p13  ;;  %s173_s11 = int_to_ptr.vmem [resolvable:$true] %s172_s11 }
  0x17   : > { %s1516_s13 = scalar_lea.vmem %s173_s11, 3456  ;;  %p1524_p6 = scmp.lt.s32.totalorder %s173_s11, %s173_s11 }
  0x18   : > { %p1507_p1 = pneg %p1747_p0  ;;  %p1517_p2 = scmp.ne.s32.totalorder %s173_s11, %s1516_s13 }
  0x19   : > { %p1525_p7 = scmp.lt.s32.totalorder %s1516_s13, %s1516_s13 }
  0x1a   : > { %p1519_p4 = pnand %p1517_p2, %p1507_p1 }
  0x1b   : > { %p1526_p9 = por %p1525_p7, %p1524_p6 }
  0x1c   : > { %p1520_p5 = pneg %p1519_p4 }
  0x1e   : > { %p1527_p11 = pnand %p1526_p9, %p1520_p5 }
  0x20   : > { %1530 = shalt.err (!%p1527_p11)
}
  0x21   : > { %s1630_s14 = smov 128   ;;  %s1631_s23 = smov 8  }
  0x22   : > { %1406 = dma.hbm_to_vmem [thread:$0]  (!%p1747_p0), %s2027_s1, 3456, %s173_s11, [#allocation4], %s1630_s14, %s1630_s14, %s1631_s23  }
  0x23   : > { %204 = sbr.rel (%p1732_p10) target bundleno = 1367 (0x557), region = 32 }
  0x28   : > { %1590 = dma.done.wait (%p1736_p12), [#allocation4], 3456  }
  0x29   : > { %1592 = vsyncadd (%p1736_p12), [#allocation4], 4294963840  ;;  %v1632_v0 = vmov 2   ;;  %v1633_v1 = vmov 0   ;;  %p238_p13 = scmp.lt.s32.totalorder %s1615_s19, 1  ;;  %v1634_v3 = vmov 3   ;;  %v300_v29 = vlaneseq }
  0x2a   : > { %1489 = vset.pattern.permute.xlu1 %v1632_v0  ;;  %1487 = vset.pattern.permute.xlu0 %v1633_v1  ;;  %v252_v2 = vld [vmem:[#allocation3] sm:$0xf]  ;;  %v1635_v4 = vmov 1   ;;  %v255_v7 = vld [vmem:[#allocation3 + $0x18] sm:$0xff]  ;;  %v253_v8 = vld [vmem:[#allocation3 + $0x8] sm:$0xff]  ;;  %v1636_v15 = vmov 0.0  }
  0x2b   : > { %347 = vperm.xlu1 %1489, %v252_v2   ;;  %296 = vperm.xlu0 %1487, %v252_v2   ;;  %s1767_s28 = scalar_select %p238_p13, %s1615_s19, 1  ;;  %v279_v5 = vld [vmem:[%s2028_s2] sm:$0xf]  ;;  %v254_v9 = vld [vmem:[#allocation3 + $0x10] sm:$0xff]  ;;  %v280_v11 = vld [vmem:[%s2028_s2 + $0x8] sm:$0xff]  ;;  %v301_v30 = vshrl.u32 %v300_v29, 7 }
  0x2c   : > { %v256_v6 = vld [vmem:[#allocation3 + $0x20] sm:$0xff]  ;;  %v282_v10 = vld [vmem:[%s2028_s2 + $0x18] sm:$0xff]  ;;  %v269_v12 = vld [vmem:[#allocation3 + $0x88] sm:$0xff]  ;;  %594 = vmatprep.mubr.f32.mxu1 %v1636_v15  ;;  %1015 = vmatprep.mubr.f32.mxu0 %v1636_v15  ;;  %s1819_s8 = sshll.u32 %s1611_s18, 1  ;;  %s2037_s0 = sld [smem:[#allocation9_spill]]  ;;  %vm517_vm0 = vcmask 261120  }
  0x2d   : > { %s250_s7 = scalar_lea.vmem %s2030_s4, %s1767_s28  ;;  %v268_v13 = vld [vmem:[#allocation3 + $0x80] sm:$0xff]  ;;  %v267_v14 = vld [vmem:[#allocation3 + $0x78] sm:$0xff]  ;;  %v266_v16 = vld [vmem:[#allocation3 + $0x70] sm:$0xff]  ;;  %p240_p10 = scmp.lt.s32.totalorder %s1819_s8, 7  ;;  %v1827_v31 = vsub.s32 0, %v301_v30  ;;  %v306_v32 = vsub.s32 4, %v301_v30 }
  0x2e   : > { %v265_v17 = vld [vmem:[#allocation3 + $0x68] sm:$0xff]  ;;  %v264_v18 = vld [vmem:[#allocation3 + $0x60] sm:$0xff]  ;;  %v263_v19 = vld [vmem:[#allocation3 + $0x58] sm:$0xff]  ;;  %s1371_s11 = sshll.u32 %s1767_s28, 3  ;;  %v1829_v33 = vsub.s32 1, %v301_v30  ;;  %v330_v34 = vsub.s32 5, %v301_v30 }
  0x2f   : > { %1490 = vset.pattern.permute.xlu1 %v1634_v3  ;;  %1488 = vset.pattern.permute.xlu0 %v1635_v4  ;;  %v262_v20 = vld [vmem:[#allocation3 + $0x50] sm:$0xff]  ;;  %v292_v21 = vld [vmem:[%s2028_s2 + $0x68] sm:$0xff]  ;;  %v283_v25 = vld [vmem:[%s2028_s2 + $0x20] sm:$0xff]  ;;  %s241_s10 = scalar_select %p240_p10, %s1819_s8, 7  ;;  %v352_v36 = vsub.s32 2, %v301_v30  ;;  %v356_v37 = vsub.s32 6, %v301_v30 }
  0x30   : > { %373 = vperm.xlu1 %1490, %v252_v2   ;;  %321 = vperm.xlu0 %1488, %v252_v2   ;;  %v290_v22 = vld [vmem:[%s2028_s2 + $0x58] sm:$0xff]  ;;  %v288_v23 = vld [vmem:[%s2028_s2 + $0x48] sm:$0xff]  ;;  %v293_v26 = vld [vmem:[%s2028_s2 + $0x70] sm:$0xf]  ;;  %v378_v40 = vsub.s32 3, %v301_v30  ;;  %v382_v41 = vsub.s32 7, %v301_v30 }
  0x31   : > { %v286_v24 = vld [vmem:[%s2028_s2 + $0x38] sm:$0xff]  ;;  %v281_v27 = vld [vmem:[%s2028_s2 + $0x10] sm:$0xff]  ;;  %v284_v28 = vld [vmem:[%s2028_s2 + $0x28] sm:$0x3]  ;;  %s243_s12 = sadd.s32 %s1371_s11, %s241_s10  ;;  %s229_s23 = sand.u32 1, %s1603_s16   ;;  %vm926_vm1 = vcmask 523264  }
  0x32   : > { %s1372_s13 = sshll.u32 %s243_s12, 2  ;;  %p1387_p12 = scmp.ne.s32.totalorder %s1611_s18, 0 }
  0x33   : > { %s245_s24 = scalar_lea.vmem %s2037_s0, %s1372_s13 }
  0x34   : > { %1491 = vset.pattern.permute.xlu1 %v1633_v1  ;;  %1492 = vset.pattern.permute.xlu0 %v1633_v1  ;;  %v251_v35 = vld [vmem:[%s245_s24] sm:$0xff]  ;;  %s1369_s24 = sshll.u32 %s229_s23, 3 }
  0x35   : > { %400 = vperm.xlu1 %1491, %v279_v5   ;;  %422 = vperm.xlu0 %1492, %v256_v6   ;;  %v303_v38 = vrot.slane %v251_v35, %v1827_v31  ;;  %v307_v39 = vrot.slane %v251_v35, %v306_v32  ;;  %v327_v42 = vrot.slane %v251_v35, %v1829_v33  ;;  %s1906_s27 = scalar_lea.vmem [#allocation6], %s1369_s24 }
  0x36   : > { %v331_v43 = vrot.slane %v251_v35, %v330_v34  ;;  %v353_v45 = vrot.slane %v251_v35, %v352_v36  ;;  %v357_v46 = vrot.slane %v251_v35, %v356_v37  ;;  %v379_v50 = vrot.slane %v251_v35, %v378_v40 }
  0x37   : > { %v313_v48 = vrot.slane %v303_v38, %v1827_v31  ;;  %v317_v49 = vrot.slane %v307_v39, %v1827_v31  ;;  %v383_v51 = vrot.slane %v251_v35, %v382_v41  ;;  %v337_v52 = vrot.slane %v327_v42, %v1829_v33 }
  0x38   : > { %v341_v53 = vrot.slane %v331_v43, %v1829_v33  ;;  %v363_v54 = vrot.slane %v353_v45, %v352_v36  ;;  %v367_v55 = vrot.slane %v357_v46, %v352_v36  ;;  %v389_v60 = vrot.slane %v379_v50, %v378_v40 }
  0x39   : > { %1493 = vset.pattern.permute.xlu1 %v1635_v4  ;;  %1495 = vset.pattern.permute.xlu0 %v1635_v4  ;;  %v393_v61 = vrot.slane %v383_v51, %v378_v40 }
  0x3a   : > { %454 = vperm.xlu1 %1493, %v256_v6   ;;  %450 = vperm.xlu0 %1495, %v255_v7  }
  0x3e   : > { %1494 = vset.pattern.permute.xlu1 %v1633_v1  ;;  %1497 = vset.pattern.permute.xlu0 %v1633_v1 }
  0x3f   : > { %417 = vperm.xlu1 %1494, %v255_v7   ;;  %407 = vperm.xlu0 %1497, %v253_v8  }
  0x43   : > { %412 = vperm.xlu1 %1494, %v254_v9   ;;  %509 = vperm.xlu0 %1497, %v282_v10  }
  0x47   : > { %1496 = vset.pattern.permute.xlu1 %v1635_v4  ;;  %499 = vperm.xlu0 %1497, %v280_v11  }
  0x48   : > { %446 = vperm.xlu1 %1496, %v254_v9  }
  0x4b   : > { %755 = vperm.xlu0 %1497, %v269_v12  }
  0x4c   : > { %442 = vperm.xlu1 %1496, %v253_v8  }
  0x4f   : > { %750 = vperm.xlu0 %1497, %v268_v13  }
  0x50   : > { %1498 = vset.pattern.permute.xlu1 %v1633_v1 }
  0x51   : > { %514 = vperm.xlu1 %1498, %v283_v25  }
  0x53   : > { %745 = vperm.xlu0 %1497, %v267_v14  }
  0x55   : > { %504 = vperm.xlu1 %1498, %v281_v27  }
  0x57   : > { %740 = vperm.xlu0 %1497, %v266_v16  }
  0x59   : > { %713 = vperm.xlu1 %1498, %v284_v28  }
  0x5b   : > { %735 = vperm.xlu0 %1497, %v265_v17  }
  0x5d   : > { %1499 = vset.pattern.permute.xlu1 %v1635_v4 }
  0x5e   : > { %811 = vperm.xlu1 %1499, %v269_v12  }
  0x5f   : > { %730 = vperm.xlu0 %1497, %v264_v18  }
  0x62   : > { %807 = vperm.xlu1 %1499, %v268_v13  }
  0x63   : > { %725 = vperm.xlu0 %1497, %v263_v19  }
  0x66   : > { %803 = vperm.xlu1 %1499, %v267_v14  }
  0x67   : > { %720 = vperm.xlu0 %1497, %v262_v20  }
  0x6a   : > { %799 = vperm.xlu1 %1499, %v266_v16  }
  0x6b   : > { %923 = vperm.xlu0 %1497, %v292_v21  }
  0x6e   : > { %795 = vperm.xlu1 %1499, %v265_v17  }
  0x6f   : > { %913 = vperm.xlu0 %1497, %v290_v22  }
  0x72   : > { %791 = vperm.xlu1 %1499, %v264_v18  }
  0x73   : > { %903 = vperm.xlu0 %1497, %v288_v23  }
  0x76   : > { %787 = vperm.xlu1 %1499, %v263_v19  }
  0x77   : > { %893 = vperm.xlu0 %1497, %v286_v24  }
  0x7a   : > { %783 = vperm.xlu1 %1499, %v262_v20  }
  0x7b   : > { %1098 = vperm.xlu0 %1497, %v293_v26  }
  0x7e   : > { %1500 = vset.pattern.permute.xlu1 %v1633_v1 }
  0xa6   : > { %v348_v44 = vpop.permute.xlu1 %347  ;;  %v297_v47 = vpop.permute.xlu0 %296 }
  0xa7   : > { %v318_v56 = vmul.f32 %v313_v48, %v297_v47  ;;  %v319_v57 = vmul.f32 %v317_v49, %v297_v47  ;;  %v368_v0 = vmul.f32 %v363_v54, %v348_v44  ;;  %v369_v1 = vmul.f32 %v367_v55, %v348_v44 }
  0xab   : > { %v374_v58 = vpop.permute.xlu1 %373  ;;  %v322_v59 = vpop.permute.xlu0 %321 }
  0xac   : > { %v342_v62 = vmul.f32 %v337_v52, %v322_v59  ;;  %v343_v63 = vmul.f32 %v341_v53, %v322_v59  ;;  %v394_v4 = vmul.f32 %v389_v60, %v374_v58  ;;  %v395_v5 = vmul.f32 %v393_v61, %v374_v58 }
  0xae   : > { %v344_v2 = vadd.f32 %v342_v62, %v318_v56  ;;  %v345_v3 = vadd.f32 %v343_v63, %v319_v57 }
  0xb0   : > { %v401_v6 = vpop.permute.xlu1 %400  ;;  %v370_v7 = vadd.f32 %v368_v0, %v344_v2  ;;  %v371_v8 = vadd.f32 %v369_v1, %v345_v3  ;;  %v423_v11 = vpop.permute.xlu0 %422 }
  0xb2   : > { %v396_v9 = vadd.f32 %v394_v4, %v370_v7  ;;  %v397_v10 = vadd.f32 %v395_v5, %v371_v8  ;;  %v257_v4 = vld [vmem:[#allocation3 + $0x28] sm:$0xff]  ;;  %v258_v5 = vld [vmem:[#allocation3 + $0x30] sm:$0xff]  ;;  %v260_v7 = vld [vmem:[#allocation3 + $0x40] sm:$0xff] }
  0xb4   : > { %v1838_v12 = vadd.f32 %v401_v6, %v396_v9  ;;  %v1840_v13 = vadd.f32 %v401_v6, %v397_v10  ;;  %v259_v6 = vld [vmem:[#allocation3 + $0x38] sm:$0xff] }
  0xb5   : > { %v455_v14 = vpop.permute.xlu1 %454  ;;  %v451_v24 = vpop.permute.xlu0 %450 }
  0xb6   : > { %v428_v16 = vrot.slane %v1838_v12, %v352_v36  ;;  %v432_v17 = vrot.slane %v1840_v13, %v352_v36  ;;  %v460_v18 = vrot.slane %v1838_v12, %v378_v40  ;;  %v464_v19 = vrot.slane %v1840_v13, %v378_v40 }
  0xb8   : > { %v439_v20 = vmul.f32 %v428_v16, %v423_v11  ;;  %v440_v21 = vmul.f32 %v432_v17, %v423_v11  ;;  %v471_v22 = vmul.f32 %v460_v18, %v455_v14  ;;  %v472_v23 = vmul.f32 %v464_v19, %v455_v14 }
  0xb9   : > { %v469_v28 = vmul.f32 %v460_v18, %v451_v24  ;;  %v470_v29 = vmul.f32 %v464_v19, %v451_v24 }
  0xba   : > { %v418_v25 = vpop.permute.xlu1 %417  ;;  %v480_v26 = vadd.f32 %v472_v23, %v440_v21  ;;  %v479_v27 = vadd.f32 %v471_v22, %v439_v20  ;;  %v408_v46 = vpop.permute.xlu0 %407 }
  0xbb   : > { %v437_v30 = vmul.f32 %v428_v16, %v418_v25  ;;  %v438_v32 = vmul.f32 %v432_v17, %v418_v25  ;;  %v433_v53 = vmul.f32 %v428_v16, %v408_v46  ;;  %v434_v54 = vmul.f32 %v432_v17, %v408_v46 }
  0xbc   : > { %v488_v34 = vmul.f32 0.01, %v480_v26  ;;  %v487_v35 = vmul.f32 0.01, %v479_v27 }
  0xbd   : > { %v477_v37 = vadd.f32 %v469_v28, %v437_v30  ;;  %v478_v36 = vadd.f32 %v470_v29, %v438_v32 }
  0xbe   : > { %v413_v38 = vpop.permute.xlu1 %412  ;;  %v496_v39 = vmax.f32 %v480_v26, %v488_v34  ;;  %v495_v41 = vmax.f32 %v479_v27, %v487_v35 }
  0xbf   : > { %v485_v40 = vmul.f32 0.01, %v477_v37  ;;  %v486_v42 = vmul.f32 0.01, %v478_v36  ;;  %v435_v47 = vmul.f32 %v428_v16, %v413_v38  ;;  %v436_v48 = vmul.f32 %v432_v17, %v413_v38  ;;  %v510_v17 = vpop.permute.xlu0 %509 }
  0xc0   : > { %554 = vmatprep.subr.mxu1 %v496_v39 }
  0xc1   : > { %555 = vmatpush1.msra.mxu1 %v495_v41  ;;  %v494_v43 = vmax.f32 %v478_v36, %v486_v42  ;;  %v493_v44 = vmax.f32 %v477_v37, %v485_v40 }
  0xc3   : > { %v447_v45 = vpop.permute.xlu1 %446  ;;  %556 = vmatprep.subr.mxu1 %v494_v43  ;;  %v500_v27 = vpop.permute.xlu0 %499 }
  0xc4   : > { %v467_v49 = vmul.f32 %v460_v18, %v447_v45  ;;  %v468_v50 = vmul.f32 %v464_v19, %v447_v45  ;;  %557 = vmatpush1.msra.mxu1 %v493_v44 }
  0xc6   : > { %v475_v51 = vadd.f32 %v467_v49, %v435_v47  ;;  %v476_v52 = vadd.f32 %v468_v50, %v436_v48  ;;  %v261_v49 = vld [vmem:[#allocation3 + $0x48] sm:$0x3]  ;;  %v291_v50 = vld [vmem:[%s2028_s2 + $0x60] sm:$0xff] }
  0xc7   : > { %v443_v55 = vpop.permute.xlu1 %442  ;;  %918 = vperm.xlu1 %1500, %v291_v50  }
  0xc8   : > { %v483_v56 = vmul.f32 0.01, %v475_v51  ;;  %v484_v57 = vmul.f32 0.01, %v476_v52  ;;  %v465_v58 = vmul.f32 %v460_v18, %v443_v55  ;;  %v466_v59 = vmul.f32 %v464_v19, %v443_v55  ;;  %v756_v55 = vpop.permute.xlu0 %755 }
  0xca   : > { %v473_v60 = vadd.f32 %v465_v58, %v433_v53  ;;  %v474_v61 = vadd.f32 %v466_v59, %v434_v54  ;;  %v492_v62 = vmax.f32 %v476_v52, %v484_v57  ;;  %v491_v63 = vmax.f32 %v475_v51, %v483_v56  ;;  %v289_v51 = vld [vmem:[%s2028_s2 + $0x50] sm:$0xff]  ;;  %v287_v52 = vld [vmem:[%s2028_s2 + $0x40] sm:$0xff] }
  0xcb   : > { %908 = vperm.xlu1 %1500, %v289_v51   ;;  %v285_v53 = vld [vmem:[%s2028_s2 + $0x30] sm:$0xff] }
  0xcc   : > { %v481_v0 = vmul.f32 0.01, %v473_v60  ;;  %v482_v1 = vmul.f32 0.01, %v474_v61  ;;  %558 = vmatprep.subr.mxu1 %v492_v62  ;;  %v515_v14 = vpop.permute.xlu1 %514  ;;  %v751_v57 = vpop.permute.xlu0 %750 }
  0xcd   : > { %559 = vmatpush1.msra.mxu1 %v491_v63 }
  0xce   : > { %v490_v2 = vmax.f32 %v474_v61, %v482_v1  ;;  %v489_v3 = vmax.f32 %v473_v60, %v481_v0 }
  0xcf   : > { %898 = vperm.xlu1 %1500, %v287_v52  }
  0xd0   : > { %560 = vmatprep.subr.mxu1 %v490_v2  ;;  %v505_v20 = vpop.permute.xlu1 %504  ;;  %v746_v59 = vpop.permute.xlu0 %745 }
  0xd1   : > { %561 = vmatpush1.msra.mxu1 %v489_v3 }
  0xd2   : > { %1373 = vmatmul.mubr.msk.f32.vlgmr.msra.gmra.mxu1 %vm517_vm0, %v257_v4 }
  0xd3   : > { %600 = vmatprep.mubr.f32.mxu1 %v1636_v15  ;;  %888 = vperm.xlu1 %1500, %v285_v53  }
  0xd4   : > { %v714_v54 = vpop.permute.xlu1 %713  ;;  %v741_v61 = vpop.permute.xlu0 %740 }
  0xd6   : > { %1374 = vmatmul.mubr.msk.f32.gmra.mxu1 %vm517_vm0, %v258_v5 }
  0xd7   : > { %606 = vmatprep.mubr.f32.mxu1 %v1636_v15 }
  0xd8   : > { %v1868_v63 = vpop.permute.xlu0 %735 }
  0xd9   : > { %v812_v56 = vpop.permute.xlu1 %811 }
  0xda   : > { %1375 = vmatmul.mubr.msk.f32.gmra.mxu1 %vm517_vm0, %v259_v6 }
  0xdb   : > { %612 = vmatprep.mubr.f32.mxu1 %v1636_v15 }
  0xdc   : > { %v1872_v1 = vpop.permute.xlu0 %730 }
  0xdd   : > { %v808_v58 = vpop.permute.xlu1 %807 }
  0xde   : > { %1376 = vmatmul.mubr.msk.f32.gmra.mxu1 %vm517_vm0, %v260_v7 }
  0xdf   : > { %702 = vmatprep.mubr.f32.mxu1 %v1636_v15 }
  0xe0   : > { %v1876_v3 = vpop.permute.xlu0 %725 }
  0xe1   : > { %v804_v60 = vpop.permute.xlu1 %803 }
  0xe5   : > { %v800_v62 = vpop.permute.xlu1 %799 }
  0xe9   : > { %v1870_v0 = vpop.permute.xlu1 %795 }
  0xed   : > { %v1874_v2 = vpop.permute.xlu1 %791 }
  0xf1   : > { %v1879_v5 = vpop.permute.xlu1 %787 }
 0x192   : > { %v596_v8 = vpop.f32.mrf.mxu1 }
 0x193   : > { %v597_v35 = vadd.f32 %v596_v8, %v500_v27 }
 0x194   : > { %v598_v9 = vpop.f32.mrf.mxu1 }
 0x195   : > { %v599_v30 = vadd.f32 %v598_v9, %v500_v27  ;;  %v619_v43 = vmul.f32 0.01, %v597_v35 }
 0x196   : > { %v602_v10 = vpop.f32.mrf.mxu1 }
 0x197   : > { %v603_v28 = vadd.f32 %v602_v10, %v505_v20  ;;  %v620_v40 = vmul.f32 0.01, %v599_v30  ;;  %v627_v48 = vmax.f32 %v597_v35, %v619_v43 }
 0x198   : > { %v604_v11 = vpop.f32.mrf.mxu1 }
 0x199   : > { %v605_v25 = vadd.f32 %v604_v11, %v505_v20  ;;  %v621_v39 = vmul.f32 0.01, %v603_v28  ;;  %v628_v47 = vmax.f32 %v599_v30, %v620_v40  ;;  %v784_v20 = vpop.permute.xlu1 %783 }
 0x19a   : > { %v608_v16 = vpop.f32.mrf.mxu1 }
 0x19b   : > { %v609_v23 = vadd.f32 %v608_v16, %v510_v17  ;;  %v622_v36 = vmul.f32 0.01, %v605_v25  ;;  %v629_v46 = vmax.f32 %v603_v28, %v621_v39  ;;  %v721_v16 = vpop.permute.xlu0 %720 }
 0x19c   : > { %v610_v18 = vpop.f32.mrf.mxu1 }
 0x19d   : > { %v611_v21 = vadd.f32 %v610_v18, %v510_v17  ;;  %v623_v37 = vmul.f32 0.01, %v609_v23  ;;  %v630_v45 = vmax.f32 %v605_v25, %v622_v36 }
 0x19e   : > { %v614_v19 = vpop.f32.mrf.mxu1 }
 0x19f   : > { %v615_v22 = vadd.f32 %v614_v19, %v515_v14  ;;  %v624_v32 = vmul.f32 0.01, %v611_v21  ;;  %v631_v44 = vmax.f32 %v609_v23, %v623_v37 }
 0x1a0   : > { %v616_v24 = vpop.f32.mrf.mxu1 }
 0x1a1   : > { %v617_v26 = vadd.f32 %v616_v24, %v515_v14  ;;  %v625_v29 = vmul.f32 0.01, %v615_v22  ;;  %v632_v42 = vmax.f32 %v611_v21, %v624_v32 }
 0x1a3   : > { %v626_v34 = vmul.f32 0.01, %v617_v26  ;;  %v633_v41 = vmax.f32 %v615_v22, %v625_v29 }
 0x1a5   : > { %v634_v38 = vmax.f32 %v617_v26, %v626_v34 }
 0x1a7   : > { %662 = vmatprep.subr.mxu1 %v634_v38 }
 0x1a8   : > { %663 = vmatpush1.msra.mxu1 %v633_v41 }
 0x1a9   : > { %664 = vmatprep.subr.mxu1 %v632_v42 }
 0x1aa   : > { %665 = vmatpush1.msra.mxu1 %v631_v44 }
 0x1ab   : > { %666 = vmatprep.subr.mxu1 %v630_v45 }
 0x1ac   : > { %667 = vmatpush1.msra.mxu1 %v629_v46 }
 0x1ad   : > { %668 = vmatprep.subr.mxu1 %v628_v47 }
 0x1ae   : > { %669 = vmatpush1.msra.mxu1 %v627_v48 }
 0x1af   : > { %1377 = vmatmul.mubr.msk.f32.vlgmr.msra.gmra.mxu1 %vm517_vm0, %v261_v49 }
 0x1b0   : > { %1168 = vmatprep.mubr.f32.mxu1 %v1636_v15 }
 0x26f   : > { %v704_v4 = vpop.f32.mrf.mxu1 }
 0x270   : > { %v709_v6 = vadd.f32 %v704_v4, %v1838_v12 }
 0x271   : > { %v706_v7 = vpop.f32.mrf.mxu1 }
 0x272   : > { %v716_v8 = vadd.f32 %v714_v54, %v709_v6  ;;  %v710_v9 = vadd.f32 %v706_v7, %v1840_v13 }
 0x274   : > { %v1886_v10 = vrot.slane %v716_v8, %v1827_v31  ;;  %v1889_v11 = vrot.slane %v716_v8, %v1829_v33  ;;  %v717_v14 = vadd.f32 %v714_v54, %v710_v9 }
 0x276   : > { %v1892_v17 = vrot.slane %v717_v14, %v1827_v31  ;;  %v1895_v18 = vrot.slane %v717_v14, %v1829_v33  ;;  %v1191_v19 = vcombine.low %v716_v8, %v717_v14  ;;  %v766_v21 = vmul.f32 %v1886_v10, %v721_v16 }
 0x277   : > { %v822_v22 = vmul.f32 %v1889_v11, %v784_v20  ;;  %v780_v23 = vmul.f32 %v1886_v10, %v756_v55  ;;  %v836_v24 = vmul.f32 %v1889_v11, %v812_v56  ;;  %v778_v25 = vmul.f32 %v1886_v10, %v751_v57 }
 0x278   : > { %v767_v26 = vmul.f32 %v1892_v17, %v721_v16  ;;  %v823_v31 = vmul.f32 %v1895_v18, %v784_v20  ;;  %v781_v27 = vmul.f32 %v1892_v17, %v756_v55  ;;  %v837_v33 = vmul.f32 %v1895_v18, %v812_v56  ;;  %1193 = vst [vmem:[%s1906_s27] sm:$0x33] %v1191_v19 }
 0x279   : > { %v852_v28 = vadd.f32 %v836_v24, %v780_v23  ;;  %v779_v29 = vmul.f32 %v1892_v17, %v751_v57  ;;  %v835_v30 = vmul.f32 %v1895_v18, %v808_v58  ;;  %v834_v34 = vmul.f32 %v1889_v11, %v808_v58 }
 0x27a   : > { %v853_v32 = vadd.f32 %v837_v33, %v781_v27  ;;  %v777_v35 = vmul.f32 %v1892_v17, %v746_v59  ;;  %v1913_v37 = vadd.f32 %v822_v22, %v766_v21  ;;  %v833_v39 = vmul.f32 %v1895_v18, %v804_v60 }
 0x27b   : > { %v868_v36 = vmul.f32 0.01, %v852_v28  ;;  %v851_v38 = vadd.f32 %v835_v30, %v779_v29  ;;  %v1916_v41 = vadd.f32 %v823_v31, %v767_v26  ;;  %v850_v42 = vadd.f32 %v834_v34, %v778_v25 }
 0x27c   : > { %v869_v40 = vmul.f32 0.01, %v853_v32  ;;  %v776_v43 = vmul.f32 %v1886_v10, %v746_v59  ;;  %v849_v46 = vadd.f32 %v833_v39, %v777_v35  ;;  %v832_v47 = vmul.f32 %v1889_v11, %v804_v60 }
 0x27d   : > { %v884_v44 = vmax.f32 %v852_v28, %v868_v36  ;;  %v867_v45 = vmul.f32 0.01, %v851_v38  ;;  %v866_v49 = vmul.f32 0.01, %v850_v42  ;;  %v775_v50 = vmul.f32 %v1892_v17, %v741_v61 }
 0x27e   : > { %v885_v48 = vmax.f32 %v853_v32, %v869_v40  ;;  %v831_v51 = vmul.f32 %v1895_v18, %v800_v62  ;;  %v865_v53 = vmul.f32 0.01, %v849_v46  ;;  %v848_v54 = vadd.f32 %v832_v47, %v776_v43  ;;  %v271_v43 = vld [vmem:[#allocation3 + $0x98] sm:$0xff]  ;;  %v277_v47 = vld [vmem:[#allocation3 + $0xc8] sm:$0xff] }
 0x27f   : > { %v883_v52 = vmax.f32 %v851_v38, %v867_v45  ;;  %v774_v55 = vmul.f32 %v1886_v10, %v741_v61  ;;  %v882_v56 = vmax.f32 %v850_v42, %v866_v49  ;;  %v830_v58 = vmul.f32 %v1889_v11, %v800_v62  ;;  %v270_v42 = vld [vmem:[#allocation3 + $0x90] sm:$0xff]  ;;  %v275_v45 = vld [vmem:[#allocation3 + $0xb8] sm:$0xff] }
 0x280   : > { %967 = vmatprep.subr.mxu0 %v885_v48  ;;  %v847_v57 = vadd.f32 %v831_v51, %v775_v50  ;;  %v773_v59 = vmul.f32 %v1892_v17, %v1868_v63  ;;  %v881_v60 = vmax.f32 %v849_v46, %v865_v53  ;;  %v864_v4 = vmul.f32 0.01, %v848_v54  ;;  %v276_v46 = vld [vmem:[#allocation3 + $0xc0] sm:$0xff] }
 0x281   : > { %968 = vmatpush1.msra.mxu0 %v884_v44  ;;  %v829_v6 = vmul.f32 %v1895_v18, %v1870_v0  ;;  %v772_v7 = vmul.f32 %v1886_v10, %v1868_v63  ;;  %v846_v61 = vadd.f32 %v830_v58, %v774_v55  ;;  %v828_v9 = vmul.f32 %v1889_v11, %v1870_v0  ;;  %v272_v44 = vld [vmem:[#allocation3 + $0xa0] sm:$0xff]  ;;  %v924_v58 = vpop.permute.xlu0 %923 }
 0x282   : > { %969 = vmatprep.subr.mxu0 %v883_v52  ;;  %v863_v8 = vmul.f32 0.01, %v847_v57  ;;  %v771_v62 = vmul.f32 %v1892_v17, %v1872_v1  ;;  %v880_v14 = vmax.f32 %v848_v54, %v864_v4  ;;  %v827_v19 = vmul.f32 %v1895_v18, %v1874_v2 }
 0x283   : > { %970 = vmatpush1.msra.mxu0 %v882_v56  ;;  %v845_v16 = vadd.f32 %v829_v6, %v773_v59  ;;  %v770_v20 = vmul.f32 %v1886_v10, %v1872_v1  ;;  %v862_v21 = vmul.f32 0.01, %v846_v61  ;;  %v844_v22 = vadd.f32 %v828_v9, %v772_v7 }
 0x284   : > { %971 = vmatprep.subr.mxu0 %v881_v60  ;;  %v879_v63 = vmax.f32 %v847_v57, %v863_v8  ;;  %v826_v23 = vmul.f32 %v1889_v11, %v1874_v2  ;;  %v843_v24 = vadd.f32 %v827_v19, %v771_v62  ;;  %v769_v25 = vmul.f32 %v1892_v17, %v1876_v3  ;;  %v919_v60 = vpop.permute.xlu1 %918 }
 0x285   : > { %972 = vmatpush1.msra.mxu0 %v880_v14  ;;  %v861_v0 = vmul.f32 0.01, %v845_v16  ;;  %v825_v26 = vmul.f32 %v1895_v18, %v1879_v5  ;;  %v878_v31 = vmax.f32 %v846_v61, %v862_v21  ;;  %v860_v27 = vmul.f32 0.01, %v844_v22  ;;  %v914_v7 = vpop.permute.xlu0 %913 }
 0x286   : > { %973 = vmatprep.subr.mxu0 %v879_v63  ;;  %v842_v1 = vadd.f32 %v826_v23, %v770_v20  ;;  %v768_v33 = vmul.f32 %v1886_v10, %v1876_v3  ;;  %v859_v29 = vmul.f32 0.01, %v843_v24  ;;  %v824_v2 = vmul.f32 %v1889_v11, %v1879_v5 }
 0x287   : > { %v877_v28 = vmax.f32 %v845_v16, %v861_v0  ;;  %v841_v30 = vadd.f32 %v825_v26, %v769_v25  ;;  %974 = vmatpush1.msra.mxu0 %v878_v31  ;;  %v876_v32 = vmax.f32 %v844_v22, %v860_v27  ;;  %v855_v36 = vmul.f32 0.01, %v1916_v41 }
 0x288   : > { %v858_v34 = vmul.f32 0.01, %v842_v1  ;;  %v875_v17 = vmax.f32 %v843_v24, %v859_v29  ;;  %v840_v18 = vadd.f32 %v824_v2, %v768_v33  ;;  %v854_v39 = vmul.f32 0.01, %v1913_v37  ;;  %v909_v8 = vpop.permute.xlu1 %908 }
 0x289   : > { %975 = vmatprep.subr.mxu0 %v877_v28  ;;  %v857_v35 = vmul.f32 0.01, %v841_v30  ;;  %v871_v5 = vmax.f32 %v1916_v41, %v855_v36  ;;  %v273_v41 = vld [vmem:[#allocation3 + $0xa8] sm:$0xff]  ;;  %v904_v63 = vpop.permute.xlu0 %903 }
 0x28a   : > { %976 = vmatpush1.msra.mxu0 %v876_v32  ;;  %v874_v38 = vmax.f32 %v842_v1, %v858_v34  ;;  %v856_v10 = vmul.f32 0.01, %v840_v18  ;;  %v870_v11 = vmax.f32 %v1913_v37, %v854_v39  ;;  %v274_v37 = vld [vmem:[#allocation3 + $0xb0] sm:$0xff] }
 0x28b   : > { %977 = vmatprep.subr.mxu0 %v875_v17  ;;  %v873_v3 = vmax.f32 %v841_v30, %v857_v35 }
 0x28c   : > { %978 = vmatpush1.msra.mxu0 %v874_v38  ;;  %v872_v40 = vmax.f32 %v840_v18, %v856_v10  ;;  %v899_v23 = vpop.permute.xlu1 %898 }
 0x28d   : > { %979 = vmatprep.subr.mxu0 %v873_v3  ;;  %v894_v17 = vpop.permute.xlu0 %893 }
 0x28e   : > { %980 = vmatpush1.msra.mxu0 %v872_v40 }
 0x28f   : > { %981 = vmatprep.subr.mxu0 %v871_v5 }
 0x290   : > { %982 = vmatpush1.msra.mxu0 %v870_v11  ;;  %v889_v39 = vpop.permute.xlu1 %888 }
 0x291   : > { %1378 = vmatmul.mubr.msk.f32.vlgmr.msra.gmra.mxu0 %vm926_vm1, %v270_v42 }
 0x292   : > { %1021 = vmatprep.mubr.f32.mxu0 %v1636_v15 }
 0x295   : > { %1379 = vmatmul.mubr.msk.f32.gmra.mxu0 %vm926_vm1, %v271_v43 }
 0x296   : > { %1027 = vmatprep.mubr.f32.mxu0 %v1636_v15 }
 0x299   : > { %1380 = vmatmul.mubr.msk.f32.gmra.mxu0 %vm926_vm1, %v272_v44 }
 0x29a   : > { %1033 = vmatprep.mubr.f32.mxu0 %v1636_v15 }
 0x29d   : > { %1381 = vmatmul.mubr.msk.f32.gmra.mxu0 %vm926_vm1, %v273_v41 }
 0x29e   : > { %1039 = vmatprep.mubr.f32.mxu0 %v1636_v15 }
 0x2a1   : > { %1382 = vmatmul.mubr.msk.f32.gmra.mxu0 %vm926_vm1, %v274_v37 }
 0x2a2   : > { %1045 = vmatprep.mubr.f32.mxu0 %v1636_v15 }
 0x2a5   : > { %1383 = vmatmul.mubr.msk.f32.gmra.mxu0 %vm926_vm1, %v275_v45 }
 0x2a6   : > { %1051 = vmatprep.mubr.f32.mxu0 %v1636_v15 }
 0x2a9   : > { %1384 = vmatmul.mubr.msk.f32.gmra.mxu0 %vm926_vm1, %v276_v46 }
 0x2aa   : > { %1057 = vmatprep.mubr.f32.mxu0 %v1636_v15 }
 0x2ad   : > { %1385 = vmatmul.mubr.msk.f32.gmra.mxu0 %vm926_vm1, %v277_v47 }
 0x351   : > { %v1017_v48 = vpop.f32.mrf.mxu0 }
 0x352   : > { %v1018_v41 = vadd.f32 %v1017_v48, %v889_v39 }
 0x353   : > { %v1019_v49 = vpop.f32.mrf.mxu0 }
 0x354   : > { %v1020_v42 = vadd.f32 %v1019_v49, %v889_v39 }
 0x355   : > { %v1023_v50 = vpop.f32.mrf.mxu0 }
 0x356   : > { %v1024_v40 = vadd.f32 %v1023_v50, %v894_v17  ;;  %v1064_v50 = vmul.f32 0.01, %v1018_v41 }
 0x357   : > { %v1025_v51 = vpop.f32.mrf.mxu0 }
 0x358   : > { %v1026_v38 = vadd.f32 %v1025_v51, %v894_v17  ;;  %v1066_v51 = vmul.f32 0.01, %v1024_v40 }
 0x359   : > { %v1029_v52 = vpop.f32.mrf.mxu0 }
 0x35a   : > { %v1030_v35 = vadd.f32 %v1029_v52, %v899_v23  ;;  %v1067_v46 = vmul.f32 0.01, %v1026_v38 }
 0x35b   : > { %v1031_v53 = vpop.f32.mrf.mxu0 }
 0x35c   : > { %v1032_v2 = vadd.f32 %v1031_v53, %v899_v23  ;;  %v1068_v37 = vmul.f32 0.01, %v1030_v35  ;;  %v1065_v53 = vmul.f32 0.01, %v1020_v42  ;;  %v1083_v49 = vmax.f32 %v1026_v38, %v1067_v46 }
 0x35d   : > { %v1035_v54 = vpop.f32.mrf.mxu0 }
 0x35e   : > { %v1036_v28 = vadd.f32 %v1035_v54, %v904_v63  ;;  %v1069_v43 = vmul.f32 0.01, %v1032_v2  ;;  %v1081_v48 = vmax.f32 %v1020_v42, %v1065_v53 }
 0x35f   : > { %v1037_v55 = vpop.f32.mrf.mxu0 }
 0x360   : > { %v1038_v27 = vadd.f32 %v1037_v55, %v904_v63  ;;  %v1070_v5 = vmul.f32 0.01, %v1036_v28  ;;  %v1085_v54 = vmax.f32 %v1032_v2, %v1069_v43  ;;  %v1084_v55 = vmax.f32 %v1030_v35, %v1068_v37 }
 0x361   : > { %v1041_v56 = vpop.f32.mrf.mxu0 }
 0x362   : > { %v1042_v26 = vadd.f32 %v1041_v56, %v909_v8  ;;  %v1071_v3 = vmul.f32 0.01, %v1038_v27  ;;  %v1086_v52 = vmax.f32 %v1036_v28, %v1070_v5  ;;  %v1082_v56 = vmax.f32 %v1024_v40, %v1066_v51 }
 0x363   : > { %v1043_v57 = vpop.f32.mrf.mxu0 }
 0x364   : > { %v1044_v0 = vadd.f32 %v1043_v57, %v909_v8  ;;  %v1072_v18 = vmul.f32 0.01, %v1042_v26  ;;  %v1087_v47 = vmax.f32 %v1038_v27, %v1071_v3  ;;  %v1080_v57 = vmax.f32 %v1018_v41, %v1064_v50 }
 0x365   : > { %v1047_v59 = vpop.f32.mrf.mxu0 }
 0x366   : > { %v1048_v21 = vadd.f32 %v1047_v59, %v914_v7  ;;  %v1073_v32 = vmul.f32 0.01, %v1044_v0  ;;  %v1088_v45 = vmax.f32 %v1042_v26, %v1072_v18  ;;  %v1099_v59 = vpop.permute.xlu0 %1098 }
 0x367   : > { %v1049_v4 = vpop.f32.mrf.mxu0 }
 0x368   : > { %v1050_v19 = vadd.f32 %v1049_v4, %v914_v7  ;;  %v1074_v29 = vmul.f32 0.01, %v1048_v21  ;;  %v1089_v44 = vmax.f32 %v1044_v0, %v1073_v32 }
 0x369   : > { %v1053_v6 = vpop.f32.mrf.mxu0 }
 0x36a   : > { %v1054_v14 = vadd.f32 %v1053_v6, %v919_v60  ;;  %v1075_v1 = vmul.f32 0.01, %v1050_v19  ;;  %v1090_v11 = vmax.f32 %v1048_v21, %v1074_v29 }
 0x36b   : > { %v1055_v15 = vpop.f32.mrf.mxu0 }
 0x36c   : > { %v1056_v9 = vadd.f32 %v1055_v15, %v919_v60  ;;  %v1076_v31 = vmul.f32 0.01, %v1054_v14  ;;  %v1091_v10 = vmax.f32 %v1050_v19, %v1075_v1 }
 0x36d   : > { %v1059_v61 = vpop.f32.mrf.mxu0 }
 0x36e   : > { %v1060_v62 = vadd.f32 %v1059_v61, %v924_v58  ;;  %v1077_v24 = vmul.f32 0.01, %v1056_v9  ;;  %v1092_v36 = vmax.f32 %v1054_v14, %v1076_v31 }
 0x36f   : > { %v1061_v16 = vpop.f32.mrf.mxu0 }
 0x370   : > { %v1062_v20 = vadd.f32 %v1061_v16, %v924_v58  ;;  %v1078_v22 = vmul.f32 0.01, %v1060_v62  ;;  %v1093_v34 = vmax.f32 %v1056_v9, %v1077_v24  ;;  %v278_v58 = vld [vmem:[#allocation3 + $0xd0] sm:$0xf] }
 0x372   : > { %v1079_v25 = vmul.f32 0.01, %v1062_v20  ;;  %v1094_v30 = vmax.f32 %v1060_v62, %v1078_v22 }
 0x374   : > { %v1095_v33 = vmax.f32 %v1062_v20, %v1079_v25 }
 0x376   : > { %1120 = vmatprep.subr.mxu1 %v1095_v33 }
 0x377   : > { %1121 = vmatpush1.msra.mxu1 %v1094_v30 }
 0x378   : > { %1122 = vmatprep.subr.mxu1 %v1093_v34 }
 0x379   : > { %1123 = vmatpush1.msra.mxu1 %v1092_v36 }
 0x37a   : > { %1124 = vmatprep.subr.mxu1 %v1091_v10 }
 0x37b   : > { %1125 = vmatpush1.msra.mxu1 %v1090_v11 }
 0x37c   : > { %1126 = vmatprep.subr.mxu1 %v1089_v44 }
 0x37d   : > { %1127 = vmatpush1.msra.mxu1 %v1088_v45 }
 0x37e   : > { %1128 = vmatprep.subr.mxu1 %v1087_v47 }
 0x37f   : > { %1129 = vmatpush1.msra.mxu1 %v1086_v52 }
 0x380   : > { %1130 = vmatprep.subr.mxu1 %v1085_v54 }
 0x381   : > { %1131 = vmatpush1.msra.mxu1 %v1084_v55 }
 0x382   : > { %1132 = vmatprep.subr.mxu1 %v1083_v49 }
 0x383   : > { %1133 = vmatpush1.msra.mxu1 %v1082_v56 }
 0x384   : > { %1134 = vmatprep.subr.mxu1 %v1081_v48 }
 0x385   : > { %1135 = vmatpush1.msra.mxu1 %v1080_v57 }
 0x386   : > { %1386 = vmatmul.mubr.msk.f32.vlgmr.msra.gmra.mxu1 %vm926_vm1, %v278_v58 }
 0x446   : > { %v1170_v60 = vpop.f32.mrf.mxu1 }
 0x447   : > { %v1171_v4 = vadd.f32 %v1170_v60, %v1099_v59 }
 0x448   : > { %v1172_v6 = vpop.f32.mrf.mxu1 }
 0x449   : > { %v1175_v7 = vmul.f32 1.442695, %v1171_v4  ;;  %v1173_v15 = vadd.f32 %v1172_v6, %v1099_v59 }
 0x44b   : > { %1501 = vpow2.f32 %v1175_v7  ;;  %v1177_v8 = vmul.f32 1.442695, %v1173_v15 }
 0x44d   : > { %1503 = vpow2.f32 %v1177_v8 }
 0x458   : > { %v1502_v61 = vpop.eup %1501 }
 0x459   : > { %v1181_v9 = vrot.slane %v1502_v61, 6 }
 0x45a   : > { %v1504_v62 = vpop.eup %1503 }
 0x45b   : > { %v1185_v14 = vmul.f32 %v1181_v9, %v1838_v12  ;;  %v1182_v16 = vrot.slane %v1504_v62, 6 }
 0x45d   : > { %v1186_v19 = vmul.f32 %v1182_v16, %v1840_v13  ;;  %v1187_v20 = vadd.f32 %v1185_v14, %v1171_v4 }
 0x45f   : > { %v1188_v63 = vadd.f32 %v1186_v19, %v1173_v15  ;;  %1202 = sbr.rel (%p1387_p12) target bundleno = 1126 (0x466), region = 40 }
 0x461   : > { %v1196_v21 = vcombine.low %v1187_v20, %v1188_v63 }
 0x463   : > { %1198 = vst [vmem:[%s1906_s27] sm:$0xcc] %v1196_v21 }
 0x464   : > { %vm1203_vm2 = vcmask 0   ;;  %v1637_v22 = vmov 0.0  }
 0x465   : > { %1204 = vst.msk [vmem:[#allocation2] sm:$0x1] %vm1203_vm2, %v1637_v22 }
 0x466 PF: > { %vm1206_vm3 = vcmask 1041408   ;;  %vm1221_vm4 = vcmask 0   ;;  %p1388_p0 = scmp.ne.s32.totalorder %s1611_s18, 3 }
 0x467   : > { %v1207_v23 = vsel %vm1206_vm3, %v1171_v4, 0.0  ;;  %v1208_v0 = vsel %vm1206_vm3, %v1173_v15, 0.0 }
 0x468   : > { %v1209_v24 = vadd.f32 %v1208_v0, %v1207_v23 }
 0x46a   : > { %1210 = vadd.xlane.f32.xlu0 %v1209_v24 }
 0x46c   : > { %v1205_v33 = vld [vmem:[#allocation2] sm:$0x1] }
 0x4f3   : > { %v1211_v12 = vpop.xlane.xlu0 %1210 }
 0x4f4   : > { %v1212_v25 = vrot.slane %v1211_v12, 4 }
 0x4f6   : > { %v1213_v26 = vadd.f32 %v1212_v25, %v1211_v12 }
 0x4f8   : > { %v1214_v13 = vrot.slane %v1213_v26, 2 }
 0x4fa   : > { %v1215_v31 = vadd.f32 %v1214_v13, %v1213_v26 }
 0x4fc   : > { %v1216_v27 = vrot.slane %v1215_v31, 1 }
 0x4fe   : > { %v1217_v1 = vadd.f32 %v1216_v27, %v1215_v31 }
 0x500   : > { %1395 = vpush %v1217_v1 }
 0x531   : > { %s1396_s5 = spop %1395  ;;  %1226 = sbr.rel (%p1388_p0) target bundleno = 1342 (0x53e), region = 44 }
 0x532   : > { %v1219_v28 = vstv %s1396_s5 }
 0x533   : > { %v1220_v29 = vadd.f32 %v1219_v28, %v1205_v33 }
 0x535   : > { %1222 = vst.msk [vmem:[#allocation2] sm:$0x1] %vm1221_vm4, %v1220_v29 }
 0x53c   : > { %v1227_v30 = vld [vmem:[#allocation2] sm:$0x1] }
 0x53d   : > { %1228 = vst.msk [vmem:[%s250_s7] sm:$0x1] %vm1221_vm4, %v1227_v30 }
 0x53e PF: > { %s1391_s11 = sshll.u32 %s1615_s19, 3  ;;  %s1249_s13 = sshll.u32 %s1906_s27, 4  ;;  %s1250_s13 = int_to_ptr.vmem [resolvable:$true] %s1249_s13 }
 0x53f   : > { %s1245_s12 = sadd.s32 %s1391_s11, %s1819_s8  ;;  %s1230_s6 = scalar_lea.sflag [#allocation5], %s229_s23 }
 0x540   : > { %s1392_s14 = sshll.u32 %s1245_s12, 6  ;;  %s1531_s10 = scalar_lea.vmem %s1250_s13, 128 }
 0x541   : > { %s1247_s5 = scalar_lea.hbm %s2029_s3, %s1392_s14  ;;  %p1532_p1 = scmp.ne.s32.totalorder %s1250_s13, %s1531_s10 }
 0x542   : > { %s1638_s28 = smov [#allocation6]  }
 0x543   : > { %p1533_p2 = pnand %p1532_p1, %p1716_p3  ;;  %s1535_s7 = sshll.u32 %s1638_s28, 4  ;;  %s1536_s7 = int_to_ptr.vmem [resolvable:$false] %s1535_s7 }
 0x544   : > { %s1537_s0 = scalar_lea.vmem %s1536_s7, 256  ;;  %p1538_p5 = scmp.lt.s32.totalorder %s1250_s13, %s1536_s7 }
 0x545   : > { %p1534_p4 = pneg %p1533_p2  ;;  %p1539_p6 = scmp.lt.s32.totalorder %s1537_s0, %s1531_s10 }
 0x547   : > { %p1540_p7 = por %p1539_p6, %p1538_p5 }
 0x549   : > { %p1541_p9 = pnand %p1540_p7, %p1534_p4 }
 0x54b   : > { %1544 = shalt.err (!%p1541_p9)
}
 0x54c   : > { %s1545_s19 = scalar_lea.hbm %s1247_s5, 128  ;;  %s1549_s27 = scalar_lea.hbm %s2029_s3, 1024 }
 0x54d   : > { %p1546_p11 = scmp.ne.s32.totalorder %s1247_s5, %s1545_s19  ;;  %p1550_p12 = scmp.lt.s32.totalorder %s1247_s5, %s2029_s3 }
 0x54e   : > { %p1551_p0 = scmp.lt.s32.totalorder %s1549_s27, %s1545_s19 }
 0x54f   : > { %p1547_p13 = pnand %p1546_p11, %p1716_p3 }
 0x550   : > { %p1552_p1 = por %p1551_p0, %p1550_p12 }
 0x551   : > { %p1548_p10 = pneg %p1547_p13 }
 0x553   : > { %p1553_p2 = pnand %p1552_p1, %p1548_p10 }
 0x555   : > { %1556 = shalt.err (!%p1553_p2)
}
 0x556   : > { %1401 = dma.vmem_to_hbm [thread:$0]  (%p1716_p3), %s1250_s13, 128, %s1247_s5, %s1230_s6  }
 0x557 PF: > { %p1413_p4 = scmp.ge.s32.totalorder %s1627_s22, 2  ;;  %s1264_s0 = sand.u32 1, %s1599_s15  }
 0x558   : > { %s1265_s14 = scalar_lea.sflag [#allocation5], %s1264_s0 }
 0x559   : > { %p1408_p5 = pnand %p1413_p4, %p1725_p8 }
 0x55b   : > { %p1409_p6 = pneg %p1408_p5 }
 0x55d   : > { %1594 = dma.done.wait (%p1409_p6), %s1265_s14, 128  }
 0x55e   : > { %1596 = vsyncadd (%p1409_p6), %s1265_s14, 4294967168  ;;  %s19_s22 = sadd.s32 1, %s1627_s22   ;;  %s2038_s15 = smov %s1603_s16 }
 0x55f   : > { %p16_p7 = scmp.ge.s32.totalorder %s19_s22, 10   ;;  %s2039_s16 = smov %s1607_s17 }
 0x560   : > { %s2040_s17 = smov %s1743_s9  ;;  %s2041_s18 = smov %s1619_s20 }
 0x561   : > { %s2042_s19 = smov %s1623_s21  ;;  %s2043_s20 = smov %s2046_s25 }
 0x562   : > { %s2044_s21 = smov %s2050_s26  ;;  %18 = sbr.rel (!%p16_p7) target bundleno = 8 (0x8), region = 92 }
 0x567   :  { %1276 = vsyncpa [#allocation4], 1 }
 0x568   :  { %1278 = vsyncpa [#allocation4 + $0x1], 1 }
 0x569   :  { %1279 = vsyncpa [#allocation5], 1 }
 0x56a   :  { %1281 = vsyncpa [#allocation5 + $0x1], 1 }

</bundles_post_ra>
